<compile_context>
chip_gen: v5e
topology: v5e:2x2
jax: 0.10.0
libtpu: 0.0.40
codegen_flags: <defaults>
</compile_context>

<pallas_src>
import jax
import jax.numpy as jnp
from jax.experimental import pallas as pl
from jax.experimental.pallas import tpu as pltpu


LANE = 1024                          # lane-dense last dim (multiple of 128)
_DEFAULT_TR = 2048                   # 2048*1024*4 B = 8 MiB/tile (v7x-safe)
_DEFAULT_VMEM_LIMIT = 48 * 1024 * 1024


def linear11_kernel(w_ref, b_ref, x_ref, o_ref):
    # w_ref, b_ref: (1,) SMEM scalars, read once and VPU-broadcast over the tile.
    # x_ref, o_ref: VMEM tiles (any 2-D shape); pure elementwise multiply-add
    # riding the VALU slots while the kernel stays DMA/HBM-bound.
    o_ref[...] = x_ref[...] * w_ref[0] + b_ref[0]


def _pick_tiling():
    """Rows-per-tile and scoped-VMEM limit, sized per TPU generation."""
    tr, vmem_limit = _DEFAULT_TR, _DEFAULT_VMEM_LIMIT
    try:
        info = pltpu.get_tpu_info()
        vmem_bytes = int(getattr(info, "vmem_capacity_bytes"))
        if vmem_bytes >= 100 * 1024 * 1024:
            # v5e / v6e: 128 MiB physical VMEM -> 16 MiB tiles, raised limit.
            tr, vmem_limit = 4096, 96 * 1024 * 1024
    except Exception:
        pass  # conservative defaults are valid on every generation (incl. v7x)
    return tr, vmem_limit


def _small_block_call(x, w, b):
    """Whole small array in one block (no grid); used for tiny / ragged pieces."""
    return pl.pallas_call(
        linear11_kernel,
        out_shape=jax.ShapeDtypeStruct(x.shape, x.dtype),
        in_specs=[
            pl.BlockSpec(memory_space=pltpu.MemorySpace.SMEM),   # w scalar
            pl.BlockSpec(memory_space=pltpu.MemorySpace.SMEM),   # b scalar
            pl.BlockSpec(memory_space=pltpu.MemorySpace.VMEM),   # full array
        ],
        out_specs=pl.BlockSpec(memory_space=pltpu.MemorySpace.VMEM),
    )(w, b, x)


def _tiled_call(x2, w, b):
    """Lane-dense (rows, LANE) streaming path."""
    rows, lane = x2.shape
    dtype = x2.dtype
    tr, vmem_limit = _pick_tiling()
    tr = min(tr, rows)                       # block == full extent is always legal
    nbytes = 2 * rows * lane * jnp.dtype(dtype).itemsize
    return pl.pallas_call(
        linear11_kernel,
        out_shape=jax.ShapeDtypeStruct((rows, lane), dtype),
        grid=(pl.cdiv(rows, tr),),           # ragged final row-block is masked
        in_specs=[
            pl.BlockSpec(memory_space=pltpu.MemorySpace.SMEM),   # w scalar
            pl.BlockSpec(memory_space=pltpu.MemorySpace.SMEM),   # b scalar
            pl.BlockSpec((tr, lane), lambda i: (i, 0)),          # x tile
        ],
        out_specs=pl.BlockSpec((tr, lane), lambda i: (i, 0)),
        compiler_params=pltpu.CompilerParams(
            dimension_semantics=("parallel",),   # harmless; shards on v7x megacore
            vmem_limit_bytes=vmem_limit,
        ),
        cost_estimate=pl.CostEstimate(
            flops=2 * rows * lane,
            transcendentals=0,
            bytes_accessed=nbytes,
        ),
    )(w, b, x2)


def _toy_model_forward_pallas(x, w, b):
    B = x.shape[0]
    flat = x.reshape(-1)                     # (B, 1) -> (B,): layout no-op
    B_main = (B // LANE) * LANE
    tail = B - B_main

    if B_main == 0:
        # Entire batch is sub-LANE: one block, no repacking or padding at all.
        return _small_block_call(x, w, b)

    rows = B_main // LANE
    x_main = (flat if tail == 0 else flat[:B_main]).reshape(rows, LANE)
    out_main = _tiled_call(x_main, w, b)
    if tail == 0:
        return out_main.reshape(B, 1)        # zero-copy back to (B, 1)

    # Ragged sub-LANE tail (< 1024 elems): tiny single-block call, then one
    # concat to rebuild (B, 1).  This is the only extra HBM pass and only
    # happens when B % LANE != 0.
    tail_out = _small_block_call(flat[B_main:].reshape(tail, 1), w, b)
    return jnp.concatenate([out_main.reshape(-1), tail_out.reshape(-1)]).reshape(B, 1)


def toy_model_forward(x, w, b, *, min_pallas_elems=1 << 17):
    """nn.Linear(1, 1) forward: y = x * w + b for x of shape (B, 1)."""
    dtype = x.dtype
    w = w.astype(dtype)                      # one promotion rule on every path
    b = b.astype(dtype)
    B = x.shape[0]
    if B < min_pallas_elems:
        # Tiny batches: fixed pallas_call overhead dwarfs 2*B flops; plain XLA
        # (which fuses into neighbours) wins.  Same dtype rule as Pallas path.
        return x * w[0] + b[0]
    return _toy_model_forward_pallas(x, w, b)


if __name__ == "__main__":
    key = jax.random.PRNGKey(0)
    kx, kw, kb = jax.random.split(key, 3)

    # nn.Linear(1, 1)-style params (deterministic uniform init).
    w = jax.random.uniform(kw, (1,), dtype=jnp.float32, minval=-1.0, maxval=1.0)
    b = jax.random.uniform(kb, (1,), dtype=jnp.float32, minval=-1.0, maxval=1.0)

    # Force the Pallas path even at small demo batches (min_pallas_elems=0) so
    # every code path is exercised:
    #   B = 8    -> single sub-LANE block (no repack, no padding)
    #   B = 4096 -> lane-dense zero-copy tiled path (B % LANE == 0)
    #   B = 3079 -> tiled main body + ragged sub-LANE tail
    for B in (8, 4096, 3079):
        x = jax.random.normal(kx, (B, 1), dtype=jnp.float32)
        out = jax.block_until_ready(toy_model_forward(x, w, b, min_pallas_elems=0))
        ref = x * w[0] + b[0]
        assert out.shape == (B, 1), f"bad shape at B={B}: {out.shape}"
        assert jnp.allclose(out, ref, atol=1e-6), f"mismatch vs reference at B={B}"

    print("KERNEL_OK")
</pallas_src>

<mosaic_0001>
module attributes {stable_mosaic.version = 11 : i64} {
  func.func @linear11_kernel(%arg0: memref<1xf32, #tpu.memory_space<smem>>, %arg1: memref<1xf32, #tpu.memory_space<smem>>, %arg2: memref<8x1xf32, #tpu.memory_space<vmem>>, %arg3: memref<8x1xf32, #tpu.memory_space<vmem>>) attributes {dimension_semantics = [], scalar_prefetch = 0 : i64, scratch_operands = 0 : i64, tpu.core_type = #tpu.core_type<tc>} {
    %c0 = arith.constant 0 : index
    %c0_0 = arith.constant 0 : index
    %0 = vector.load %arg2[%c0, %c0_0] : memref<8x1xf32, #tpu.memory_space<vmem>>, vector<8x1xf32>
    %c0_1 = arith.constant 0 : index
    %1 = memref.load %arg0[%c0_1] : memref<1xf32, #tpu.memory_space<smem>>
    %2 = vector.broadcast %1 : f32 to vector<8x1xf32>
    %3 = arith.mulf %0, %2 : vector<8x1xf32>
    %c0_2 = arith.constant 0 : index
    %4 = memref.load %arg1[%c0_2] : memref<1xf32, #tpu.memory_space<smem>>
    %5 = vector.broadcast %4 : f32 to vector<8x1xf32>
    %6 = arith.addf %3, %5 : vector<8x1xf32>
    %c0_3 = arith.constant 0 : index
    %c0_4 = arith.constant 0 : index
    %7 = vector.load %arg3[%c0_3, %c0_4] : memref<8x1xf32, #tpu.memory_space<vmem>>, vector<8x1xf32>
    tpu.vector_store %arg3[%c0_3, %c0_4], %6 {strides = array<i32>} : memref<8x1xf32, #tpu.memory_space<vmem>>, vector<8x1xf32>,
    return
  }
}

</mosaic_0001>

<bundles_post_ra>
// kernel: tpu_custom_call.1
= control target key start
LH: loop header
LB: loop body
LE: loop exit
PB: predicated region body
PF: predicated region fallthrough
CT: control target
= control target key end

     0   :  { %vm23_vm0 = vcmask 7168   ;;  %s61_s0 = inlined_call_operand.<no memory space> [shape: f32[1], index: 0, kind: input, shape index: {}]   ;;  %s62_s1 = inlined_call_operand.<no memory space> [shape: f32[1], index: 1, kind: input, shape index: {}]   ;;  %s63_s2 = inlined_call_operand.vmem [shape: f32[8,1], index: 2, kind: input, shape index: {}]   ;;  %s64_s3 = inlined_call_operand.vmem [shape: f32[8,1], index: 3, kind: output, shape index: {}]  }
   0x1   :  { %v16_v0 = vld [vmem:[%s63_s2] sm:$0xff]  ;;  %v18_v1 = vstv %s61_s0  ;;  %v21_v2 = vstv %s62_s1 }
   0x2   :  { %v19_v3 = vmul.f32 %v18_v1, %v16_v0 }
   0x4   :  { %v22_v4 = vadd.f32 %v21_v2, %v19_v3 }
   0x6   :  { %24 = vst.msk [vmem:[%s64_s3] sm:$0xff] %vm23_vm0, %v22_v4 }

</bundles_post_ra>
